<compile_context>
chip_gen: v7x
topology: tpu7x:2x2x1
jax: 0.10.0
libtpu: 0.0.40
codegen_flags: <defaults>
</compile_context>

<pallas_src>
import functools

import jax
import jax.numpy as jnp
from jax.experimental import pallas as pl
from jax.experimental.pallas import tpu as pltpu


def _round_up(n: int, m: int) -> int:
    return ((n + m - 1) // m) * m


def _mlp_kernel(x_ref, w1_ref, b1_ref, w2_ref, b2_ref, o_ref):
    # Two MXU matmuls with f32 accumulation; bias add + ReLU on the VPU in f32.
    h = jnp.dot(x_ref[...], w1_ref[...], preferred_element_type=jnp.float32)
    h = jnp.maximum(h + b1_ref[...], 0.0)          # F.relu, f32 (v5e-safe)
    h = h.astype(w2_ref.dtype)                     # back to compute dtype for MXU
    y = jnp.dot(h, w2_ref[...], preferred_element_type=jnp.float32) + b2_ref[...]
    o_ref[...] = y.astype(o_ref.dtype)


def prepare_params(w1_t, b1, w2_t, b2, *, compute_dtype=None):
    """One-time padding/casting of the weights.

    w1_t: (in, hid), b1: (1, hid) or (hid,), w2_t: (hid, out), b2: (1, out) or (out,).
    HID/OUT are padded to multiples of 128 (lane-dense, MXU friendly); the input
    feature dim is left at its true size.  Zero padding is exact: padded hidden
    columns have zero weight + zero bias (ReLU(0)=0) and feed zero rows of w2;
    padded output columns are sliced off in the forward.
    """
    in_f, hid = w1_t.shape
    hid2, out_f = w2_t.shape
    assert hid == hid2, "w1/w2 hidden dims must match"

    cdt = jnp.dtype(compute_dtype) if compute_dtype is not None else jnp.dtype(w1_t.dtype)
    HID = _round_up(hid, 128)
    OUT = _round_up(out_f, 128)

    b1 = jnp.asarray(b1).reshape(1, hid)
    b2 = jnp.asarray(b2).reshape(1, out_f)

    w1p = jnp.zeros((in_f, HID), cdt).at[:, :hid].set(w1_t.astype(cdt))
    b1p = jnp.zeros((1, HID), jnp.float32).at[:, :hid].set(b1.astype(jnp.float32))
    w2p = jnp.zeros((HID, OUT), cdt).at[:hid, :out_f].set(w2_t.astype(cdt))
    b2p = jnp.zeros((1, OUT), jnp.float32).at[:, :out_f].set(b2.astype(jnp.float32))
    return w1p, b1p, w2p, b2p, hid, out_f


@functools.partial(jax.jit, static_argnames=("hidden_features", "out_features", "tile_b"))
def linear_qnet_forward(x, w1p, b1p, w2p, b2p, *, hidden_features, out_features,
                        tile_b=None):
    """Single-dispatch forward: batch pad -> pallas_call -> slice."""
    orig_dtype = x.dtype
    B, in_f = x.shape
    assert w1p.shape[0] == in_f, "x feature dim must match w1"
    HID = w1p.shape[1]
    OUT = w2p.shape[1]

    cdt = jnp.dtype(w1p.dtype)                      # compute dtype chosen at prepare time
    sub = 16 if cdt == jnp.dtype(jnp.bfloat16) else 8

    # Batch tile: ~4 grid steps for large batches (enables 2-TC sharding on
    # v7x + pipelining), single step for small batches.  Per-step overhead is
    # ~0.35us so 4 steps costs ~1.4us even on 1-TC chips (v5e/v6e).
    if tile_b is None:
        tile_b = min(max(sub, _round_up(pl.cdiv(B, 4), sub)), 1024)
    TILE_B = max(sub, _round_up(min(tile_b, _round_up(B, sub)), sub))
    BP = _round_up(B, TILE_B)

    # Pad only batch rows; x keeps its true feature width (block last dim ==
    # full array dim is legal under the (8,128) rule).
    xp = x.astype(cdt)
    if BP != B:
        xp = jnp.pad(xp, ((0, BP - B), (0, 0)))

    itm = cdt.itemsize
    o_itm = jnp.dtype(orig_dtype).itemsize

    # VMEM: double-buffered x/out tiles + resident weights/biases + f32 hidden temp.
    vmem_need = int(
        2 * TILE_B * in_f * itm
        + 2 * TILE_B * OUT * o_itm
        + 2 * (in_f * HID + HID * OUT) * itm
        + 4 * (HID + OUT) * 4
        + 2 * TILE_B * HID * 4)
    # Clamp to 48 MiB: safe on v7x (64 MiB physical per TC), harmless on v5e/v6e.
    vmem_bytes = min(max(vmem_need + (4 << 20), 16 << 20), 48 << 20)

    # Cost from true (unpadded) problem dims.
    cost = pl.CostEstimate(
        flops=2 * B * (in_f * hidden_features + hidden_features * out_features),
        transcendentals=0,
        bytes_accessed=int(
            B * in_f * itm
            + (in_f * hidden_features + hidden_features * out_features) * itm
            + (hidden_features + out_features) * 4
            + B * out_features * o_itm),
    )

    out = pl.pallas_call(
        _mlp_kernel,
        out_shape=jax.ShapeDtypeStruct((BP, OUT), orig_dtype),
        grid_spec=pltpu.PrefetchScalarGridSpec(
            num_scalar_prefetch=0,
            grid=(BP // TILE_B,),
            in_specs=[
                pl.BlockSpec((TILE_B, in_f), lambda i: (i, 0)),  # x: tiled over batch
                pl.BlockSpec((in_f, HID), lambda i: (0, 0)),     # weights: resident
                pl.BlockSpec((1, HID), lambda i: (0, 0)),
                pl.BlockSpec((HID, OUT), lambda i: (0, 0)),
                pl.BlockSpec((1, OUT), lambda i: (0, 0)),
            ],
            out_specs=pl.BlockSpec((TILE_B, OUT), lambda i: (i, 0)),
        ),
        compiler_params=pltpu.CompilerParams(
            dimension_semantics=("parallel",),
            vmem_limit_bytes=int(vmem_bytes),
        ),
        cost_estimate=cost,
    )(xp, w1p, b1p, w2p, b2p)

    return out[:B, :out_features]


class LinearQNet:
    """Pallas-backed Linear_QNet: y = ReLU(x @ W1 + b1) @ W2 + b2.

    Pads/casts weights exactly once at construction; every __call__ is a
    single jitted dispatch.
    """

    def __init__(self, w1_t, b1, w2_t, b2, *, compute_dtype=None):
        (self.w1p, self.b1p, self.w2p, self.b2p,
         self.hidden_size, self.output_size) = prepare_params(
            w1_t, b1, w2_t, b2, compute_dtype=compute_dtype)

    def __call__(self, x, tile_b=None):
        return linear_qnet_forward(
            x, self.w1p, self.b1p, self.w2p, self.b2p,
            hidden_features=self.hidden_size,
            out_features=self.output_size,
            tile_b=tile_b)


def init_params(key, input_size, hidden_size, output_size, dtype=jnp.float32):
    """Deterministic init mimicking nn.Linear's uniform(-1/sqrt(fan_in), 1/sqrt(fan_in))."""
    k1, k2, k3, k4 = jax.random.split(key, 4)
    lim1 = 1.0 / (input_size ** 0.5)
    lim2 = 1.0 / (hidden_size ** 0.5)
    # Stored already transposed: (in, out).
    w1_t = jax.random.uniform(k1, (input_size, hidden_size), dtype, -lim1, lim1)
    b1 = jax.random.uniform(k2, (1, hidden_size), dtype, -lim1, lim1)
    w2_t = jax.random.uniform(k3, (hidden_size, output_size), dtype, -lim2, lim2)
    b2 = jax.random.uniform(k4, (1, output_size), dtype, -lim2, lim2)
    return w1_t, b1, w2_t, b2


def reference_forward(x, w1_t, b1, w2_t, b2):
    h = jnp.maximum(x @ w1_t + b1, 0.0)
    return h @ w2_t + b2


# TODO(synk): Linear_QNet.save() (torch.save checkpointing) is host-side file
# I/O with no Pallas equivalent; not implemented.

if __name__ == "__main__":
    input_size, hidden_size, output_size = 16, 32, 4
    batch = 2

    key = jax.random.PRNGKey(0)
    kx, kp = jax.random.split(key)
    x = jax.random.normal(kx, (batch, input_size), jnp.float32)
    w1_t, b1, w2_t, b2 = init_params(kp, input_size, hidden_size, output_size)

    # f32 compute path (matches PyTorch semantics to tight tolerance).
    net = LinearQNet(w1_t, b1, w2_t, b2)
    out = jax.block_until_ready(net(x))
    ref = reference_forward(x, w1_t, b1, w2_t, b2)
    assert out.shape == (batch, output_size)
    assert jnp.allclose(out, ref, atol=1e-5, rtol=1e-5)

    # Replay-buffer-style batch exercises the multi-step batch grid (4 tiles of
    # 128 rows -> double-buffered x/out DMA, 2-TC sharding on v7x).
    xb = jax.random.normal(kx, (500, input_size), jnp.float32)
    outb = jax.block_until_ready(net(xb))
    refb = reference_forward(xb, w1_t, b1, w2_t, b2)
    assert outb.shape == (500, output_size)
    assert jnp.allclose(outb, refb, atol=1e-4, rtol=1e-4)

    # Opt-in bf16 compute path (v6e/v7x MXU) with f32 accumulation; looser tolerance.
    net_bf16 = LinearQNet(w1_t, b1, w2_t, b2, compute_dtype=jnp.bfloat16)
    outbf = jax.block_until_ready(net_bf16(xb))
    assert outbf.shape == (500, output_size)
    assert jnp.allclose(outbf, refb, atol=5e-2, rtol=5e-2)

    print("KERNEL_OK")
</pallas_src>

<mosaic_0001>
module attributes {stable_mosaic.version = 11 : i64} {
  func.func @_mlp_kernel(%arg0: i32, %arg1: memref<8x16xf32, #tpu.memory_space<vmem>>, %arg2: memref<16x128xf32, #tpu.memory_space<vmem>>, %arg3: memref<1x128xf32, #tpu.memory_space<vmem>>, %arg4: memref<128x128xf32, #tpu.memory_space<vmem>>, %arg5: memref<1x128xf32, #tpu.memory_space<vmem>>, %arg6: memref<8x128xf32, #tpu.memory_space<vmem>>) attributes {dimension_semantics = [#tpu.dimension_semantics<parallel>], iteration_bounds = array<i64: 1>, scalar_prefetch = 0 : i64, scratch_operands = 0 : i64, tpu.core_type = #tpu.core_type<tc>, window_params = [{transform_indices = @transform_0, window_bounds = array<i64: 8, 16>}, {pipeline_mode = #tpu.pipeline_mode<synchronous>, transform_indices = @transform_1, window_bounds = array<i64: 16, 128>}, {pipeline_mode = #tpu.pipeline_mode<synchronous>, transform_indices = @transform_2, window_bounds = array<i64: 1, 128>}, {pipeline_mode = #tpu.pipeline_mode<synchronous>, transform_indices = @transform_3, window_bounds = array<i64: 128, 128>}, {pipeline_mode = #tpu.pipeline_mode<synchronous>, transform_indices = @transform_4, window_bounds = array<i64: 1, 128>}, {transform_indices = @transform_5, window_bounds = array<i64: 8, 128>}]} {
    %c0 = arith.constant 0 : index
    %c0_0 = arith.constant 0 : index
    %0 = vector.load %arg1[%c0, %c0_0] : memref<8x16xf32, #tpu.memory_space<vmem>>, vector<8x16xf32>
    %c0_1 = arith.constant 0 : index
    %c0_2 = arith.constant 0 : index
    %1 = vector.load %arg2[%c0_1, %c0_2] : memref<16x128xf32, #tpu.memory_space<vmem>>, vector<16x128xf32>
    %cst = arith.constant dense<0.000000e+00> : vector<8x128xf32>
    %2 = tpu.matmul %0, %1, %cst {dimension_numbers = #tpu.dot_dimension_numbers<[1], [0], [0], [1], [0, 0, 1, 1], [], []>} : vector<8x16xf32>, vector<16x128xf32>, vector<8x128xf32> -> vector<8x128xf32>
    %c0_3 = arith.constant 0 : index
    %c0_4 = arith.constant 0 : index
    %3 = vector.load %arg3[%c0_3, %c0_4] : memref<1x128xf32, #tpu.memory_space<vmem>>, vector<1x128xf32>
    %4 = vector.broadcast %3 : vector<1x128xf32> to vector<8x128xf32>
    %5 = arith.addf %2, %4 : vector<8x128xf32>
    %cst_5 = arith.constant 0.000000e+00 : f32
    %6 = vector.broadcast %cst_5 : f32 to vector<8x128xf32>
    %7 = arith.maximumf %5, %6 : vector<8x128xf32>
    %c0_6 = arith.constant 0 : index
    %c0_7 = arith.constant 0 : index
    %8 = vector.load %arg4[%c0_6, %c0_7] : memref<128x128xf32, #tpu.memory_space<vmem>>, vector<128x128xf32>
    %cst_8 = arith.constant dense<0.000000e+00> : vector<8x128xf32>
    %9 = tpu.matmul %7, %8, %cst_8 {dimension_numbers = #tpu.dot_dimension_numbers<[1], [0], [0], [1], [0, 0, 1, 1], [], []>} : vector<8x128xf32>, vector<128x128xf32>, vector<8x128xf32> -> vector<8x128xf32>
    %c0_9 = arith.constant 0 : index
    %c0_10 = arith.constant 0 : index
    %10 = vector.load %arg5[%c0_9, %c0_10] : memref<1x128xf32, #tpu.memory_space<vmem>>, vector<1x128xf32>
    %11 = vector.broadcast %10 : vector<1x128xf32> to vector<8x128xf32>
    %12 = arith.addf %9, %11 : vector<8x128xf32>
    %c0_11 = arith.constant 0 : index
    %c0_12 = arith.constant 0 : index
    %13 = vector.load %arg6[%c0_11, %c0_12] : memref<8x128xf32, #tpu.memory_space<vmem>>, vector<8x128xf32>
    tpu.vector_store %arg6[%c0_11, %c0_12], %12 {strides = array<i32>} : memref<8x128xf32, #tpu.memory_space<vmem>>, vector<8x128xf32>,
    return
  }
  func.func @transform_0(%arg0: i32) -> (i32, i32) {
    %c0_i32 = arith.constant 0 : i32
    %c0_i32_0 = arith.constant 0 : i32
    return %arg0, %c0_i32 : i32, i32
  }
  func.func @transform_1(%arg0: i32) -> (i32, i32) {
    %c0_i32 = arith.constant 0 : i32
    %c0_i32_0 = arith.constant 0 : i32
    %c0_i32_1 = arith.constant 0 : i32
    return %c0_i32, %c0_i32_0 : i32, i32
  }
  func.func @transform_2(%arg0: i32) -> (i32, i32) {
    %c0_i32 = arith.constant 0 : i32
    %c0_i32_0 = arith.constant 0 : i32
    %c0_i32_1 = arith.constant 0 : i32
    return %c0_i32, %c0_i32_0 : i32, i32
  }
  func.func @transform_3(%arg0: i32) -> (i32, i32) {
    %c0_i32 = arith.constant 0 : i32
    %c0_i32_0 = arith.constant 0 : i32
    %c0_i32_1 = arith.constant 0 : i32
    return %c0_i32, %c0_i32_0 : i32, i32
  }
  func.func @transform_4(%arg0: i32) -> (i32, i32) {
    %c0_i32 = arith.constant 0 : i32
    %c0_i32_0 = arith.constant 0 : i32
    %c0_i32_1 = arith.constant 0 : i32
    return %c0_i32, %c0_i32_0 : i32, i32
  }
  func.func @transform_5(%arg0: i32) -> (i32, i32) {
    %c0_i32 = arith.constant 0 : i32
    %c0_i32_0 = arith.constant 0 : i32
    return %arg0, %c0_i32 : i32, i32
  }
}

</mosaic_0001>

<bundles_post_ra>
// kernel: linear_qnet_forward.1
= control target key start
LH: loop header
LB: loop body
LE: loop exit
PB: predicated region body
PF: predicated region fallthrough
CT: control target
= control target key end

     0   :  { %10 = vsyncpa [#allocation3], 0  ;;  %s453_s0 = inlined_call_operand.vmem [shape: f32[8,16], index: 0, kind: input, shape index: {}]   ;;  %s454_s1 = inlined_call_operand.hbm [shape: f32[16,128], index: 1, kind: input, shape index: {}]   ;;  %s455_s2 = inlined_call_operand.vmem [shape: f32[1,128], index: 2, kind: input, shape index: {}]   ;;  %s456_s3 = inlined_call_operand.hbm [shape: f32[128,128], index: 3, kind: input, shape index: {}]   ;;  %s457_s4 = inlined_call_operand.vmem [shape: f32[1,128], index: 4, kind: input, shape index: {}]   ;;  %s458_s5 = inlined_call_operand.vmem [shape: f32[8,128], index: 5, kind: output, shape index: {}]  }
   0x1   :  { %11 = vsyncpa [#allocation5], 0  ;;  %s380_s18 = smov [#allocation2]   ;;  %s332_s22 = scalar_lea.hbm %s454_s1, 256 }
   0x2   :  { %s19_s19 = sshll.u32 %s380_s18, 4  ;;  %p333_p0 = scmp.ne.s32.totalorder %s454_s1, %s332_s22  ;;  %s20_s19 = int_to_ptr.vmem [resolvable:$true] %s19_s19 }
   0x3   :  { %p336_p1 = scmp.lt.u32.totalorder %s332_s22, %s454_s1 }
   0x5   :  { %p338_p2 = pnand %p336_p1, %p333_p0 }
   0x7   :  { %341 = shalt.err (!%p338_p2)
}
   0x8   :  { %s342_s27 = scalar_lea.vmem %s20_s19, 256  ;;  %p347_p4 = scmp.lt.s32.totalorder %s20_s19, %s20_s19 }
   0x9   :  { %p343_p3 = scmp.ne.s32.totalorder %s20_s19, %s342_s27  ;;  %p348_p5 = scmp.lt.s32.totalorder %s342_s27, %s342_s27 }
   0xb   :  { %p349_p6 = por %p348_p5, %p347_p4 }
   0xd   :  { %p350_p7 = pnand %p349_p6, %p343_p3 }
   0xf   :  { %353 = shalt.err (!%p350_p7)
}
  0x10   :  { %s381_s28 = smov 128   ;;  %s382_s29 = smov 8  }
  0x11   :  { %25 = dma.hbm_to_vmem [thread:$0]  %s454_s1, 256, %s20_s19, [#allocation3], %s381_s28, %s381_s28, %s382_s29  }
  0x12   :  { %s383_s7 = smov [#allocation4]   ;;  %s354_s11 = scalar_lea.hbm %s456_s3, 2048 }
  0x13   :  { %s33_s8 = sshll.u32 %s383_s7, 4  ;;  %p355_p8 = scmp.ne.s32.totalorder %s456_s3, %s354_s11  ;;  %s34_s8 = int_to_ptr.vmem [resolvable:$true] %s33_s8 }
  0x14   :  { %p358_p9 = scmp.lt.u32.totalorder %s354_s11, %s456_s3 }
  0x16   :  { %p360_p10 = pnand %p358_p9, %p355_p8 }
  0x18   :  { %363 = shalt.err (!%p360_p10)
}
  0x19   :  { %s364_s16 = scalar_lea.vmem %s34_s8, 2048  ;;  %p369_p12 = scmp.lt.s32.totalorder %s34_s8, %s34_s8 }
  0x1a   :  { %p365_p11 = scmp.ne.s32.totalorder %s34_s8, %s364_s16  ;;  %p370_p13 = scmp.lt.s32.totalorder %s364_s16, %s364_s16 }
  0x1c   :  { %p371_p0 = por %p370_p13, %p369_p12 }
  0x1e   :  { %p372_p1 = pnand %p371_p0, %p365_p11 }
  0x20   :  { %375 = shalt.err (!%p372_p1)
}
  0x21   :  { %39 = dma.hbm_to_vmem [thread:$0]  %s456_s3, 2048, %s34_s8, [#allocation5], %s381_s28, %s381_s28, %s382_s29  }
  0x22   :  { %376 = dma.done.wait [#allocation3], 256  }
  0x23   :  { %377 = vsyncadd [#allocation3], 4294967040 }
  0x24   :  { %378 = dma.done.wait [#allocation5], 2048  }
  0x25   :  { %379 = vsyncadd [#allocation5], 4294965248  ;;  %v384_v0 = vmov 0.0|0.0   ;;  %vm385_vm0 = vmmov 0   ;;  %v386_v1 = vmov 0.0   ;;  %v49_v2 = vld [vmem:[#allocation2] sm:$0xff] }
  0x26   :  { %298 = vmatprep.subr.bf16.mxu0 %v384_v0  ;;  %260 = vmatprep.mubr.msk.f32.mxu0 %vm385_vm0, %v386_v1  ;;  %v50_v3 = vld [vmem:[#allocation2 + $0x8] sm:$0xff]  ;;  %v133_v5 = vld [vmem:[#allocation4] sm:$0xff]  ;;  %v134_v6 = vld [vmem:[#allocation4 + $0x8] sm:$0xff]  ;;  %vm58_vm1 = vcmask 130048  }
  0x27   :  { %301 = vmatprep.subr.bf16.mxu1 %v384_v0  ;;  %295 = vmatprep.mubr.msk.f32.mxu1 %vm385_vm0, %v386_v1  ;;  %v299_v4 = vpack.c.bf16 %v50_v3, %v49_v2  ;;  %v135_v7 = vld [vmem:[#allocation4 + $0x10] sm:$0xff]  ;;  %v302_v8 = vpack.c.bf16 %v134_v6, %v133_v5  ;;  %v136_v9 = vld [vmem:[#allocation4 + $0x18] sm:$0xff]  ;;  %v137_v12 = vld [vmem:[#allocation4 + $0x20] sm:$0xff] }
  0x28   :  { %v48_v10 = vld [vmem:[%s453_s0] sm:$0xff]  ;;  %v305_v11 = vpack.c.bf16 %v136_v9, %v135_v7  ;;  %v138_v13 = vld [vmem:[#allocation4 + $0x28] sm:$0xff]  ;;  %v140_v16 = vld [vmem:[#allocation4 + $0x38] sm:$0xff] }
  0x29   :  { %300 = vmatpush3.bf16.msra.mxu0 %v299_v4  ;;  %303 = vmatpush3.bf16.msra.mxu1 %v302_v8  ;;  %v308_v14 = vpack.c.bf16 %v138_v13, %v137_v12  ;;  %v139_v15 = vld [vmem:[#allocation4 + $0x30] sm:$0xff]  ;;  %v141_v18 = vld [vmem:[#allocation4 + $0x40] sm:$0xff]  ;;  %v142_v19 = vld [vmem:[#allocation4 + $0x48] sm:$0xff] }
  0x2a   :  { %304 = vmatprep.subr.bf16.mxu1 %v384_v0  ;;  %v311_v17 = vpack.c.bf16 %v140_v16, %v139_v15  ;;  %v314_v20 = vpack.c.bf16 %v142_v19, %v141_v18  ;;  %v143_v21 = vld [vmem:[#allocation4 + $0x50] sm:$0xff]  ;;  %v144_v22 = vld [vmem:[#allocation4 + $0x58] sm:$0xff]  ;;  %v145_v24 = vld [vmem:[#allocation4 + $0x60] sm:$0xff] }
  0x2b   :  { %v317_v23 = vpack.c.bf16 %v144_v22, %v143_v21  ;;  %v146_v25 = vld [vmem:[#allocation4 + $0x68] sm:$0xff]  ;;  %v147_v27 = vld [vmem:[#allocation4 + $0x70] sm:$0xff]  ;;  %v148_v28 = vld [vmem:[#allocation4 + $0x78] sm:$0xff] }
  0x2c   :  { %261 = vmatmul.mubr.msk.f32.vlgmr.msra.gmra.mrb[0].mxu0 %vm58_vm1, %v48_v10  ;;  %v320_v26 = vpack.c.bf16 %v146_v25, %v145_v24  ;;  %v323_v29 = vpack.c.bf16 %v148_v28, %v147_v27  ;;  %v233_v30 = vld [vmem:[%s455_s2] ss:$0 sm:$0xff] }
  0x2d   :  { %306 = vmatpush3.bf16.msra.mxu1 %v305_v11  ;;  %v235_v35 = vld [vmem:[%s457_s4] ss:$0 sm:$0xff] }
  0x2e   :  { %307 = vmatprep.subr.bf16.mxu1 %v384_v0 }
  0x31   :  { %309 = vmatpush3.bf16.msra.mxu1 %v308_v14 }
  0x32   :  { %310 = vmatprep.subr.bf16.mxu1 %v384_v0 }
  0x35   :  { %312 = vmatpush3.bf16.msra.mxu1 %v311_v17 }
  0x36   :  { %313 = vmatprep.subr.bf16.mxu1 %v384_v0 }
  0x39   :  { %315 = vmatpush3.bf16.msra.mxu1 %v314_v20 }
  0x3a   :  { %316 = vmatprep.subr.bf16.mxu1 %v384_v0 }
  0x3d   :  { %318 = vmatpush3.bf16.msra.mxu1 %v317_v23 }
  0x3e   :  { %319 = vmatprep.subr.bf16.mxu1 %v384_v0 }
  0x41   :  { %321 = vmatpush3.bf16.msra.mxu1 %v320_v26 }
  0x42   :  { %322 = vmatprep.subr.bf16.mxu1 %v384_v0 }
  0x45   :  { %324 = vmatpush3.bf16.msra.mxu1 %v323_v29 }
  0xff   :  { %v128_v31 = vpop.f32.mrb[0].mxu0 }
 0x100   :  { %v129_v32 = vadd.f32 %v233_v30, %v128_v31  ;;  %v262_v33 = vpop.f32.mrb[1].mxu0 }
 0x102   :  { %v132_v34 = vmax.f32 %v129_v32, 0.0 }
 0x104   :  { %296 = vmatmul.mubr.f32.vlgmr.msra.gmra.mrb[0].mxu1 %v132_v34 }
 0x1d7   :  { %v222_v36 = vpop.f32.mrb[0].mxu1 }
 0x1d8   :  { %v223_v37 = vadd.f32 %v235_v35, %v222_v36  ;;  %v297_v38 = vpop.f32.mrb[1].mxu1 }
 0x1da   :  { %226 = vst [vmem:[%s458_s5] sm:$0xff] %v223_v37 }
 0x1db   :  { %231 = vsyncpa [#allocation3], 1 }
 0x1dc   :  { %232 = vsyncpa [#allocation5], 1 }

</bundles_post_ra>
